<compile_context>
chip_gen: v7x
topology: tpu7x:2x2x1
jax: 0.10.0
libtpu: 0.0.40
codegen_flags: <defaults>
</compile_context>

<pallas_src>
import jax
import jax.numpy as jnp
from jax.experimental import pallas as pl
from jax.experimental.pallas import tpu as pltpu

COL_INPUT = 581
COL_HIDE1 = 290
COL_HIDE2 = 150
COL_OUT = 70

# Lane-dense (multiple-of-128) padded output dims of each layer.
H1_PAD = 384    # 3 * 128  (>= 290)
H2_PAD = 256    # 2 * 128  (>= 150)
OUT_PAD = 128   # 1 * 128  (>= 70)

MAX_BLOCK_B = 1024     # batch-tile ceiling (sweepable; ~2.4 MiB f32 x tile)
SINGLE_TILE_B = 256    # below this, a single full-dim batch block (no padding)


def _round_up(x, m):
    return ((x + m - 1) // m) * m


def _pad_to(a, shape):
    pads = [(0, t - s) for s, t in zip(a.shape, shape)]
    return jnp.pad(a, pads)


def colnet_kernel(x_ref, w1_ref, b1_ref, w2_ref, b2_ref, w3_ref, b3_ref, o_ref):
    # x arrives f32 / unpadded (K = 581); cast to bf16 in-register for the MXU.
    x = x_ref[...].astype(jnp.bfloat16)
    # Layer 1: Linear(581 -> 384) + bias + ReLU  (bf16 matmul, f32 accumulate)
    h1 = jnp.dot(x, w1_ref[...], preferred_element_type=jnp.float32)
    h1 = jnp.maximum(h1 + b1_ref[...], 0.0)
    # Layer 2: Linear(384 -> 256) + bias + ReLU
    h2 = jnp.dot(h1.astype(jnp.bfloat16), w2_ref[...],
                 preferred_element_type=jnp.float32)
    h2 = jnp.maximum(h2 + b2_ref[...], 0.0)
    # Layer 3: Linear(256 -> 128) + bias + ReLU  (padded lanes stay exactly 0)
    h3 = jnp.dot(h2.astype(jnp.bfloat16), w3_ref[...],
                 preferred_element_type=jnp.float32)
    o_ref[...] = jnp.maximum(h3 + b3_ref[...], 0.0).astype(o_ref.dtype)


def prepare_params(w1, b1, w2, b2, w3, b3):
    """One-time pad + cast of the parameters (hoisted out of the forward path).

    w1 keeps its true contraction dim (581); only layer-output dims are padded
    to multiples of 128.  Biases stay f32 for the f32 bias+ReLU epilogue."""
    w1p = _pad_to(w1, (COL_INPUT, H1_PAD)).astype(jnp.bfloat16)
    b1p = _pad_to(b1.reshape(1, -1), (1, H1_PAD)).astype(jnp.float32)
    w2p = _pad_to(w2, (H1_PAD, H2_PAD)).astype(jnp.bfloat16)
    b2p = _pad_to(b2.reshape(1, -1), (1, H2_PAD)).astype(jnp.float32)
    w3p = _pad_to(w3, (H2_PAD, OUT_PAD)).astype(jnp.bfloat16)
    b3p = _pad_to(b3.reshape(1, -1), (1, OUT_PAD)).astype(jnp.float32)
    return w1p, b1p, w2p, b2p, w3p, b3p


def _batch_tiling(B):
    if B <= SINGLE_TILE_B:
        # One full-dim batch block: legal regardless of alignment, no padding.
        return B, B
    n_steps = max(2, pl.cdiv(B, MAX_BLOCK_B))   # >=2 steps -> both v7x TCs busy
    TB = min(MAX_BLOCK_B, _round_up(pl.cdiv(B, n_steps), 16))
    B_pad = _round_up(B, TB)
    return TB, B_pad


def colnet_forward(x, w1p, b1p, w2p, b2p, w3p, b3p, *, strip_padding=True):
    """x: (B, 581) float32.  Parameters must come from prepare_params()."""
    B = x.shape[0]
    TB, B_pad = _batch_tiling(B)
    x = x.astype(jnp.float32)
    if B_pad != B:
        # Only the (small) ragged tail is padded; common power-of-two batches
        # take the no-copy path.
        x = jnp.pad(x, ((0, B_pad - B), (0, 0)))

    grid = (B_pad // TB,)
    out_padded = pl.pallas_call(
        colnet_kernel,
        out_shape=jax.ShapeDtypeStruct((B_pad, OUT_PAD), jnp.bfloat16),
        grid=grid,
        in_specs=[
            # x tile follows the batch grid; full (unpadded) 581-wide last dim.
            pl.BlockSpec((TB, COL_INPUT), lambda i: (i, 0)),
            # Weights / biases: constant block index -> resident across grid.
            pl.BlockSpec((COL_INPUT, H1_PAD), lambda i: (0, 0)),
            pl.BlockSpec((1, H1_PAD), lambda i: (0, 0)),
            pl.BlockSpec((H1_PAD, H2_PAD), lambda i: (0, 0)),
            pl.BlockSpec((1, H2_PAD), lambda i: (0, 0)),
            pl.BlockSpec((H2_PAD, OUT_PAD), lambda i: (0, 0)),
            pl.BlockSpec((1, OUT_PAD), lambda i: (0, 0)),
        ],
        out_specs=pl.BlockSpec((TB, OUT_PAD), lambda i: (i, 0)),
        compiler_params=pltpu.CompilerParams(
            # Batch axis is embarrassingly parallel; on multi-core parts this
            # is the axis that shards across TensorCores.
            dimension_semantics=("parallel",),
        ),
    )(x, w1p, b1p, w2p, b2p, w3p, b3p)

    if strip_padding:
        # Consumers that can read the 128-lane-padded bf16 slab directly
        # should pass strip_padding=False and avoid this extra copy.
        return out_padded[:B, :COL_OUT]
    return out_padded


def init_params(key):
    # Deterministic synthetic init (PyTorch-Linear-like uniform fan-in scaling).
    ks = jax.random.split(key, 6)

    def lin(kw, kb, fan_in, fan_out):
        bound = 1.0 / jnp.sqrt(jnp.float32(fan_in))
        w = jax.random.uniform(kw, (fan_in, fan_out), jnp.float32, -bound, bound)
        b = jax.random.uniform(kb, (1, fan_out), jnp.float32, -bound, bound)
        return w, b

    w1, b1 = lin(ks[0], ks[1], COL_INPUT, COL_HIDE1)
    w2, b2 = lin(ks[2], ks[3], COL_HIDE1, COL_HIDE2)
    w3, b3 = lin(ks[4], ks[5], COL_HIDE2, COL_OUT)
    return w1, b1, w2, b2, w3, b3


def reference_forward(x, w1, b1, w2, b2, w3, b3):
    h1 = jnp.maximum(x @ w1 + b1, 0.0)
    h2 = jnp.maximum(h1 @ w2 + b2, 0.0)
    return jnp.maximum(h2 @ w3 + b3, 0.0)


if __name__ == "__main__":
    key = jax.random.PRNGKey(0)
    k_x, k_p = jax.random.split(key)

    B = 8  # small demo batch
    x = jax.random.normal(k_x, (B, COL_INPUT), jnp.float32)
    params = init_params(k_p)

    # Pad/cast weights once (outside the per-call path).
    prepped = prepare_params(*params)

    out = colnet_forward(x, *prepped)
    out = jax.block_until_ready(out)

    ref = reference_forward(x, *params)
    assert out.shape == (B, COL_OUT)
    # bf16 weights/activations/output with f32 accumulation -> loose tolerance.
    assert jnp.allclose(out.astype(jnp.float32), ref, atol=5e-2, rtol=5e-2)

    print("KERNEL_OK")
</pallas_src>

<mosaic_0001>
module attributes {stable_mosaic.version = 11 : i64} {
  func.func @colnet_kernel(%arg0: i32, %arg1: memref<8x581xf32, #tpu.memory_space<vmem>>, %arg2: memref<581x384xbf16, #tpu.memory_space<vmem>>, %arg3: memref<1x384xf32, #tpu.memory_space<vmem>>, %arg4: memref<384x256xbf16, #tpu.memory_space<vmem>>, %arg5: memref<1x256xf32, #tpu.memory_space<vmem>>, %arg6: memref<256x128xbf16, #tpu.memory_space<vmem>>, %arg7: memref<1x128xf32, #tpu.memory_space<vmem>>, %arg8: memref<8x128xbf16, #tpu.memory_space<vmem>>) attributes {dimension_semantics = [#tpu.dimension_semantics<parallel>], iteration_bounds = array<i64: 1>, scalar_prefetch = 0 : i64, scratch_operands = 0 : i64, tpu.core_type = #tpu.core_type<tc>, window_params = [{transform_indices = @transform_0, window_bounds = array<i64: 8, 581>}, {pipeline_mode = #tpu.pipeline_mode<synchronous>, transform_indices = @transform_1, window_bounds = array<i64: 581, 384>}, {pipeline_mode = #tpu.pipeline_mode<synchronous>, transform_indices = @transform_2, window_bounds = array<i64: 1, 384>}, {pipeline_mode = #tpu.pipeline_mode<synchronous>, transform_indices = @transform_3, window_bounds = array<i64: 384, 256>}, {pipeline_mode = #tpu.pipeline_mode<synchronous>, transform_indices = @transform_4, window_bounds = array<i64: 1, 256>}, {pipeline_mode = #tpu.pipeline_mode<synchronous>, transform_indices = @transform_5, window_bounds = array<i64: 256, 128>}, {pipeline_mode = #tpu.pipeline_mode<synchronous>, transform_indices = @transform_6, window_bounds = array<i64: 1, 128>}, {transform_indices = @transform_7, window_bounds = array<i64: 8, 128>}]} {
    %c0 = arith.constant 0 : index
    %c0_0 = arith.constant 0 : index
    %0 = vector.load %arg1[%c0, %c0_0] : memref<8x581xf32, #tpu.memory_space<vmem>>, vector<8x581xf32>
    %1 = arith.truncf %0 : vector<8x581xf32> to vector<8x581xbf16>
    %c0_1 = arith.constant 0 : index
    %c0_2 = arith.constant 0 : index
    %2 = vector.load %arg2[%c0_1, %c0_2] : memref<581x384xbf16, #tpu.memory_space<vmem>>, vector<581x384xbf16>
    %cst = arith.constant dense<0.000000e+00> : vector<8x384xf32>
    %3 = tpu.matmul %1, %2, %cst {dimension_numbers = #tpu.dot_dimension_numbers<[1], [0], [0], [1], [0, 0, 1, 1], [], []>} : vector<8x581xbf16>, vector<581x384xbf16>, vector<8x384xf32> -> vector<8x384xf32>
    %c0_3 = arith.constant 0 : index
    %c0_4 = arith.constant 0 : index
    %4 = vector.load %arg3[%c0_3, %c0_4] : memref<1x384xf32, #tpu.memory_space<vmem>>, vector<1x384xf32>
    %5 = vector.broadcast %4 : vector<1x384xf32> to vector<8x384xf32>
    %6 = arith.addf %3, %5 : vector<8x384xf32>
    %cst_5 = arith.constant 0.000000e+00 : f32
    %7 = vector.broadcast %cst_5 : f32 to vector<8x384xf32>
    %8 = arith.maximumf %6, %7 : vector<8x384xf32>
    %9 = arith.truncf %8 : vector<8x384xf32> to vector<8x384xbf16>
    %c0_6 = arith.constant 0 : index
    %c0_7 = arith.constant 0 : index
    %10 = vector.load %arg4[%c0_6, %c0_7] : memref<384x256xbf16, #tpu.memory_space<vmem>>, vector<384x256xbf16>
    %cst_8 = arith.constant dense<0.000000e+00> : vector<8x256xf32>
    %11 = tpu.matmul %9, %10, %cst_8 {dimension_numbers = #tpu.dot_dimension_numbers<[1], [0], [0], [1], [0, 0, 1, 1], [], []>} : vector<8x384xbf16>, vector<384x256xbf16>, vector<8x256xf32> -> vector<8x256xf32>
    %c0_9 = arith.constant 0 : index
    %c0_10 = arith.constant 0 : index
    %12 = vector.load %arg5[%c0_9, %c0_10] : memref<1x256xf32, #tpu.memory_space<vmem>>, vector<1x256xf32>
    %13 = vector.broadcast %12 : vector<1x256xf32> to vector<8x256xf32>
    %14 = arith.addf %11, %13 : vector<8x256xf32>
    %cst_11 = arith.constant 0.000000e+00 : f32
    %15 = vector.broadcast %cst_11 : f32 to vector<8x256xf32>
    %16 = arith.maximumf %14, %15 : vector<8x256xf32>
    %17 = arith.truncf %16 : vector<8x256xf32> to vector<8x256xbf16>
    %c0_12 = arith.constant 0 : index
    %c0_13 = arith.constant 0 : index
    %18 = vector.load %arg6[%c0_12, %c0_13] : memref<256x128xbf16, #tpu.memory_space<vmem>>, vector<256x128xbf16>
    %cst_14 = arith.constant dense<0.000000e+00> : vector<8x128xf32>
    %19 = tpu.matmul %17, %18, %cst_14 {dimension_numbers = #tpu.dot_dimension_numbers<[1], [0], [0], [1], [0, 0, 1, 1], [], []>} : vector<8x256xbf16>, vector<256x128xbf16>, vector<8x128xf32> -> vector<8x128xf32>
    %c0_15 = arith.constant 0 : index
    %c0_16 = arith.constant 0 : index
    %20 = vector.load %arg7[%c0_15, %c0_16] : memref<1x128xf32, #tpu.memory_space<vmem>>, vector<1x128xf32>
    %21 = vector.broadcast %20 : vector<1x128xf32> to vector<8x128xf32>
    %22 = arith.addf %19, %21 : vector<8x128xf32>
    %cst_17 = arith.constant 0.000000e+00 : f32
    %23 = vector.broadcast %cst_17 : f32 to vector<8x128xf32>
    %24 = arith.maximumf %22, %23 : vector<8x128xf32>
    %25 = arith.truncf %24 : vector<8x128xf32> to vector<8x128xbf16>
    %c0_18 = arith.constant 0 : index
    %c0_19 = arith.constant 0 : index
    %26 = vector.load %arg8[%c0_18, %c0_19] : memref<8x128xbf16, #tpu.memory_space<vmem>>, vector<8x128xbf16>
    tpu.vector_store %arg8[%c0_18, %c0_19], %25 {strides = array<i32>} : memref<8x128xbf16, #tpu.memory_space<vmem>>, vector<8x128xbf16>,
    return
  }
  func.func @transform_0(%arg0: i32) -> (i32, i32) {
    %c0_i32 = arith.constant 0 : i32
    %c0_i32_0 = arith.constant 0 : i32
    return %arg0, %c0_i32 : i32, i32
  }
  func.func @transform_1(%arg0: i32) -> (i32, i32) {
    %c0_i32 = arith.constant 0 : i32
    %c0_i32_0 = arith.constant 0 : i32
    %c0_i32_1 = arith.constant 0 : i32
    return %c0_i32, %c0_i32_0 : i32, i32
  }
  func.func @transform_2(%arg0: i32) -> (i32, i32) {
    %c0_i32 = arith.constant 0 : i32
    %c0_i32_0 = arith.constant 0 : i32
    %c0_i32_1 = arith.constant 0 : i32
    return %c0_i32, %c0_i32_0 : i32, i32
  }
  func.func @transform_3(%arg0: i32) -> (i32, i32) {
    %c0_i32 = arith.constant 0 : i32
    %c0_i32_0 = arith.constant 0 : i32
    %c0_i32_1 = arith.constant 0 : i32
    return %c0_i32, %c0_i32_0 : i32, i32
  }
  func.func @transform_4(%arg0: i32) -> (i32, i32) {
    %c0_i32 = arith.constant 0 : i32
    %c0_i32_0 = arith.constant 0 : i32
    %c0_i32_1 = arith.constant 0 : i32
    return %c0_i32, %c0_i32_0 : i32, i32
  }
  func.func @transform_5(%arg0: i32) -> (i32, i32) {
    %c0_i32 = arith.constant 0 : i32
    %c0_i32_0 = arith.constant 0 : i32
    %c0_i32_1 = arith.constant 0 : i32
    return %c0_i32, %c0_i32_0 : i32, i32
  }
  func.func @transform_6(%arg0: i32) -> (i32, i32) {
    %c0_i32 = arith.constant 0 : i32
    %c0_i32_0 = arith.constant 0 : i32
    %c0_i32_1 = arith.constant 0 : i32
    return %c0_i32, %c0_i32_0 : i32, i32
  }
  func.func @transform_7(%arg0: i32) -> (i32, i32) {
    %c0_i32 = arith.constant 0 : i32
    %c0_i32_0 = arith.constant 0 : i32
    return %arg0, %c0_i32 : i32, i32
  }
}

</mosaic_0001>

<bundles_post_ra>
// kernel: tpu_custom_call.1
= control target key start
LH: loop header
LB: loop body
LE: loop exit
PB: predicated region body
PF: predicated region fallthrough
CT: control target
= control target key end

     0   :  { %12 = vsyncpa [#allocation3], 0  ;;  %s2479_s0 = inlined_call_operand.hbm [shape: f32[8,581], index: 0, kind: input, shape index: {}]   ;;  %s2480_s1 = inlined_call_operand.hbm [shape: bf16[581,384], index: 1, kind: input, shape index: {}]   ;;  %s2481_s2 = inlined_call_operand.vmem [shape: f32[1,384], index: 2, kind: input, shape index: {}]   ;;  %s2482_s3 = inlined_call_operand.hbm [shape: bf16[384,256], index: 3, kind: input, shape index: {}]   ;;  %s2483_s4 = inlined_call_operand.vmem [shape: f32[1,256], index: 4, kind: input, shape index: {}]   ;;  %s2484_s5 = inlined_call_operand.hbm [shape: bf16[256,128], index: 5, kind: input, shape index: {}]   ;;  %s2485_s6 = inlined_call_operand.vmem [shape: f32[1,128], index: 6, kind: input, shape index: {}]   ;;  %s2486_s7 = inlined_call_operand.hbm [shape: bf16[8,128], index: 7, kind: output, shape index: {}]  }
   0x1   :  { %13 = vsyncpa [#allocation6], 0 }
   0x2   :  { %14 = vsyncpa [#allocation9], 0 }
   0x3   :  { %15 = vsyncpa [#allocation4], 0  ;;  %s2333_s24 = smov [#allocation5]   ;;  %s2215_s28 = scalar_lea.hbm %s2480_s1, 14016 }
   0x4   :  { %s31_s25 = sshll.u32 %s2333_s24, 4  ;;  %p2216_p0 = scmp.ne.s32.totalorder %s2480_s1, %s2215_s28  ;;  %s32_s25 = int_to_ptr.vmem [resolvable:$true] %s31_s25 }
   0x5   :  { %p2219_p1 = scmp.lt.u32.totalorder %s2215_s28, %s2480_s1 }
   0x7   :  { %p2221_p2 = pnand %p2219_p1, %p2216_p0 }
   0x9   :  { %2224 = shalt.err (!%p2221_p2)
}
   0xa   :  { %s2225_s10 = scalar_lea.vmem %s32_s25, 14016  ;;  %p2230_p4 = scmp.lt.s32.totalorder %s32_s25, %s32_s25 }
   0xb   :  { %p2226_p3 = scmp.ne.s32.totalorder %s32_s25, %s2225_s10  ;;  %p2231_p5 = scmp.lt.s32.totalorder %s2225_s10, %s2225_s10 }
   0xd   :  { %p2232_p6 = por %p2231_p5, %p2230_p4 }
   0xf   :  { %p2233_p7 = pnand %p2232_p6, %p2226_p3 }
  0x11   :  { %2236 = shalt.err (!%p2233_p7)
}
  0x12   :  { %s2334_s11 = smov 192   ;;  %s2335_s12 = smov 12  }
  0x13   :  { %37 = dma.hbm_to_vmem [thread:$0]  %s2480_s1, 14016, %s32_s25, [#allocation6], %s2334_s11, %s2334_s11, %s2335_s12  }
  0x14   :  { %s2336_s15 = smov [#allocation2]   ;;  %s2337_s17 = smov [#allocation7]  }
  0x15   :  { %s22_s16 = sshll.u32 %s2336_s15, 4  ;;  %s45_s18 = sshll.u32 %s2337_s17, 4  ;;  %s23_s16 = int_to_ptr.vmem [resolvable:$true] %s22_s16  ;;  %s46_s18 = int_to_ptr.vmem [resolvable:$true] %s45_s18 }
  0x16   :  { %s2237_s21 = scalar_lea.hbm %s2479_s0, 640 }
  0x17   :  { %p2238_p8 = scmp.ne.s32.totalorder %s2479_s0, %s2237_s21  ;;  %p2241_p9 = scmp.lt.u32.totalorder %s2237_s21, %s2479_s0 }
  0x19   :  { %p2243_p10 = pnand %p2241_p9, %p2238_p8 }
  0x1b   :  { %2246 = shalt.err (!%p2243_p10)
}
  0x1c   :  { %s2247_s1 = scalar_lea.vmem %s23_s16, 640  ;;  %p2252_p12 = scmp.lt.s32.totalorder %s23_s16, %s23_s16 }
  0x1d   :  { %p2248_p11 = scmp.ne.s32.totalorder %s23_s16, %s2247_s1  ;;  %p2253_p13 = scmp.lt.s32.totalorder %s2247_s1, %s2247_s1 }
  0x1f   :  { %p2254_p0 = por %p2253_p13, %p2252_p12 }
  0x21   :  { %p2255_p1 = pnand %p2254_p0, %p2248_p11 }
  0x23   :  { %2258 = shalt.err (!%p2255_p1)
}
  0x24   :  { %25 = dma.hbm_to_vmem [thread:$0]  %s2479_s0, 640, %s23_s16, [#allocation3]  }
  0x25   :  { %s2259_s30 = scalar_lea.hbm %s2482_s3, 6144 }
  0x26   :  { %p2260_p2 = scmp.ne.s32.totalorder %s2482_s3, %s2259_s30  ;;  %p2263_p3 = scmp.lt.u32.totalorder %s2259_s30, %s2482_s3 }
  0x28   :  { %p2265_p4 = pnand %p2263_p3, %p2260_p2 }
  0x2a   :  { %2268 = shalt.err (!%p2265_p4)
}
  0x2b   :  { %s2269_s12 = scalar_lea.vmem %s46_s18, 6144  ;;  %p2274_p6 = scmp.lt.s32.totalorder %s46_s18, %s46_s18 }
  0x2c   :  { %p2270_p5 = scmp.ne.s32.totalorder %s46_s18, %s2269_s12  ;;  %p2275_p7 = scmp.lt.s32.totalorder %s2269_s12, %s2269_s12 }
  0x2e   :  { %p2276_p8 = por %p2275_p7, %p2274_p6 }
  0x30   :  { %p2277_p9 = pnand %p2276_p8, %p2270_p5 }
  0x32   :  { %2280 = shalt.err (!%p2277_p9)
}
  0x33   :  { %s2338_s0 = smov 128   ;;  %s2339_s13 = smov 8  }
  0x34   :  { %51 = dma.hbm_to_vmem [thread:$0]  %s2482_s3, 6144, %s46_s18, [#allocation6], %s2338_s0, %s2338_s0, %s2339_s13  }
  0x35   :  { %s2340_s16 = smov [#allocation8]   ;;  %s2281_s21 = scalar_lea.hbm %s2484_s5, 2048 }
  0x36   :  { %s59_s17 = sshll.u32 %s2340_s16, 4  ;;  %p2282_p10 = scmp.ne.s32.totalorder %s2484_s5, %s2281_s21  ;;  %s60_s17 = int_to_ptr.vmem [resolvable:$true] %s59_s17 }
  0x37   :  { %p2285_p11 = scmp.lt.u32.totalorder %s2281_s21, %s2484_s5 }
  0x39   :  { %p2287_p12 = pnand %p2285_p11, %p2282_p10 }
  0x3b   :  { %2290 = shalt.err (!%p2287_p12)
}
  0x3c   :  { %s2291_s1 = scalar_lea.vmem %s60_s17, 2048  ;;  %p2296_p0 = scmp.lt.s32.totalorder %s60_s17, %s60_s17 }
  0x3d   :  { %p2292_p13 = scmp.ne.s32.totalorder %s60_s17, %s2291_s1  ;;  %p2297_p1 = scmp.lt.s32.totalorder %s2291_s1, %s2291_s1 }
  0x3f   :  { %p2298_p2 = por %p2297_p1, %p2296_p0 }
  0x41   :  { %p2299_p3 = pnand %p2298_p2, %p2292_p13 }
  0x43   :  { %2302 = shalt.err (!%p2299_p3)
}
  0x44   :  { %s2341_s3 = smov 64   ;;  %s2342_s18 = smov 4  }
  0x45   :  { %65 = dma.hbm_to_vmem [thread:$0]  %s2484_s5, 2048, %s60_s17, [#allocation9], %s2341_s3, %s2341_s3, %s2342_s18  }
  0x46   :  { %2325 = dma.done.wait [#allocation3], 640  }
  0x47   :  { %2326 = vsyncadd [#allocation3], 4294966656 }
  0x48   :  { %2327 = dma.done.wait [#allocation6], 20160  }
  0x49   :  { %2328 = vsyncadd [#allocation6], 4294947136 }
  0x4a   :  { %2329 = dma.done.wait [#allocation9], 2048  }
  0x4b   :  { %2330 = vsyncadd [#allocation9], 4294965248  ;;  %v1980_v0 = vld [vmem:[#allocation5 + $0x4] ss:$12 sps:$4 sm:$0xff]   ;;  %v1982_v1 = vld [vmem:[#allocation5] ss:$12 sps:$4 sm:$0xff]  }
  0x4c   :  { %855 = vmatprep.subr.bf16.mxu0 %v1980_v0  ;;  %v1983_v2 = vld [vmem:[#allocation5 + $0x1c] ss:$12 sps:$4 sm:$0xff]   ;;  %v1985_v3 = vld [vmem:[#allocation5 + $0x18] ss:$12 sps:$4 sm:$0xff]   ;;  %v1986_v4 = vld [vmem:[#allocation5 + $0x34] ss:$12 sps:$4 sm:$0xff]  }
  0x4d   :  { %856 = vmatpush1.bf16.msra.mxu0 %v1982_v1  ;;  %v1988_v5 = vld [vmem:[#allocation5 + $0x30] ss:$12 sps:$4 sm:$0xff]   ;;  %v1989_v6 = vld [vmem:[#allocation5 + $0x4c] ss:$12 sps:$4 sm:$0xff]   ;;  %v1991_v7 = vld [vmem:[#allocation5 + $0x48] ss:$12 sps:$4 sm:$0xff]  }
  0x4e   :  { %857 = vmatprep.subr.bf16.mxu0 %v1983_v2  ;;  %v1992_v8 = vld [vmem:[#allocation5 + $0x64] ss:$12 sps:$4 sm:$0xff]   ;;  %v1994_v9 = vld [vmem:[#allocation5 + $0x60] ss:$12 sps:$4 sm:$0xff]   ;;  %v1995_v10 = vld [vmem:[#allocation5 + $0x7c] ss:$12 sps:$4 sm:$0xff]  }
  0x4f   :  { %v1997_v11 = vld [vmem:[#allocation5 + $0x78] ss:$12 sps:$4 sm:$0xff]   ;;  %v1998_v12 = vld [vmem:[#allocation5 + $0x94] ss:$12 sps:$4 sm:$0xff]   ;;  %v2000_v15 = vld [vmem:[#allocation5 + $0x90] ss:$12 sps:$4 sm:$0xff]  }
  0x50   :  { %v2021_v13 = vld [vmem:[#allocation5 + $0xc8] ss:$12 sps:$4 sm:$0xff]   ;;  %v2026_v16 = vld [vmem:[#allocation5 + $0xe0] ss:$12 sps:$4 sm:$0xff]   ;;  %v2031_v19 = vld [vmem:[#allocation5 + $0xf8] ss:$12 sps:$4 sm:$0xff]  }
  0x51   :  { %858 = vmatpush1.bf16.msra.mxu0 %v1985_v3  ;;  %v2023_v14 = vld [vmem:[#allocation5 + $0x8] ss:$12 sps:$4 sm:$0xff]   ;;  %1863 = vmatprep.subr.bf16.mxu1 %v2021_v13  ;;  %v2028_v17 = vld [vmem:[#allocation5 + $0x20] ss:$12 sps:$4 sm:$0xff]   ;;  %v2033_v21 = vld [vmem:[#allocation5 + $0x38] ss:$12 sps:$4 sm:$0xff]  }
  0x52   :  { %859 = vmatprep.subr.bf16.mxu0 %v1986_v4  ;;  %1864 = vmatpush3.bf16.msra.mxu1 %v2023_v14  ;;  %v2001_v18 = vld [vmem:[#allocation5 + $0xac] ss:$12 sps:$4 sm:$0xff]   ;;  %v2003_v20 = vld [vmem:[#allocation5 + $0xa8] ss:$12 sps:$4 sm:$0xff]   ;;  %v82_v22 = vld [vmem:[#allocation2 + $0x8] sm:$0xff]  ;;  %vm2344_vm0 = vmmov 0  }
  0x53   :  { %1865 = vmatprep.subr.bf16.mxu1 %v2026_v16  ;;  %v2004_v23 = vld [vmem:[#allocation5 + $0xc4] ss:$12 sps:$4 sm:$0xff]   ;;  %v87_v24 = vpack.c.bf16 %v82_v22, %v82_v22  ;;  %v2006_v26 = vld [vmem:[#allocation5 + $0xc0] ss:$12 sps:$4 sm:$0xff]   ;;  %v2007_v28 = vld [vmem:[#allocation5 + $0xdc] ss:$12 sps:$4 sm:$0xff]  }
  0x54   :  { %v2037_v25 = vld [vmem:[#allocation5 + $0x110] ss:$12 sps:$4 sm:$0xff]   ;;  %v2042_v29 = vld [vmem:[#allocation5 + $0x128] ss:$12 sps:$4 sm:$0xff]   ;;  %v2009_v31 = vld [vmem:[#allocation5 + $0xd8] ss:$12 sps:$4 sm:$0xff]  }
  0x55   :  { %860 = vmatpush1.bf16.msra.mxu0 %v1988_v5  ;;  %887 = vmatprep.mubr.bf16.mxu0 %v87_v24  ;;  %v2038_v27 = vld [vmem:[#allocation5 + $0x50] ss:$12 sps:$4 sm:$0xff]   ;;  %v2043_v30 = vld [vmem:[#allocation5 + $0x68] ss:$12 sps:$4 sm:$0xff]   ;;  %v2047_v33 = vld [vmem:[#allocation5 + $0x140] ss:$12 sps:$4 sm:$0xff]  }
  0x56   :  { %861 = vmatprep.subr.bf16.mxu0 %v1989_v6  ;;  %1866 = vmatpush3.bf16.msra.mxu1 %v2028_v17  ;;  %v2010_v32 = vld [vmem:[#allocation5 + $0xf4] ss:$12 sps:$4 sm:$0xff]   ;;  %v2012_v34 = vld [vmem:[#allocation5 + $0xf0] ss:$12 sps:$4 sm:$0xff]   ;;  %v2013_v36 = vld [vmem:[#allocation5 + $0x10c] ss:$12 sps:$4 sm:$0xff]  }
  0x57   :  { %1867 = vmatprep.subr.bf16.mxu1 %v2031_v19  ;;  %1010 = vmatprep.mubr.bf16.mxu1 %v87_v24  ;;  %v2048_v35 = vld [vmem:[#allocation5 + $0x80] ss:$12 sps:$4 sm:$0xff]   ;;  %v2052_v37 = vld [vmem:[#allocation5 + $0x158] ss:$12 sps:$4 sm:$0xff]   ;;  %v2015_v38 = vld [vmem:[#allocation5 + $0x108] ss:$12 sps:$4 sm:$0xff]  }
  0x58   :  { %v2053_v39 = vld [vmem:[#allocation5 + $0x98] ss:$12 sps:$4 sm:$0xff]   ;;  %v2057_v40 = vld [vmem:[#allocation5 + $0x170] ss:$12 sps:$4 sm:$0xff]   ;;  %v2018_v42 = vld [vmem:[#allocation5 + $0x120] ss:$12 sps:$4 sm:$0xff]  }
  0x59   :  { %862 = vmatpush1.bf16.msra.mxu0 %v1991_v7  ;;  %v2016_v41 = vld [vmem:[#allocation5 + $0x124] ss:$12 sps:$4 sm:$0xff]   ;;  %v2019_v43 = vld [vmem:[#allocation5 + $0x13c] ss:$12 sps:$4 sm:$0xff]   ;;  %v2067_v50 = vld [vmem:[#allocation5 + $0x260] ss:$12 sps:$4 sm:$0xff]  }
  0x5a   :  { %863 = vmatprep.subr.bf16.mxu0 %v1992_v8  ;;  %1868 = vmatpush3.bf16.msra.mxu1 %v2033_v21  ;;  %v2058_v44 = vld [vmem:[#allocation5 + $0xb0] ss:$12 sps:$4 sm:$0xff]   ;;  %v2062_v45 = vld [vmem:[#allocation5 + $0x248] ss:$12 sps:$4 sm:$0xff]   ;;  %v2022_v47 = vld [vmem:[#allocation5 + $0x138] ss:$12 sps:$4 sm:$0xff]  }
  0x5b   :  { %1869 = vmatprep.subr.bf16.mxu1 %v2037_v25  ;;  %v81_v46 = vld [vmem:[#allocation2] sm:$0xff]  ;;  %v2063_v48 = vld [vmem:[#allocation5 + $0x188] ss:$12 sps:$4 sm:$0xff]   ;;  %v2068_v52 = vld [vmem:[#allocation5 + $0x1a0] ss:$12 sps:$4 sm:$0xff]   ;;  %v2343_v21 = vmov 0.0  }
  0x5c   :  { %v86_v49 = vpack.c.bf16 %v81_v46, %v81_v46  ;;  %v2024_v51 = vld [vmem:[#allocation5 + $0x154] ss:$12 sps:$4 sm:$0xff]   ;;  %v2027_v53 = vld [vmem:[#allocation5 + $0x150] ss:$12 sps:$4 sm:$0xff]   ;;  %v2072_v54 = vld [vmem:[#allocation5 + $0x278] ss:$12 sps:$4 sm:$0xff]  }
  0x5d   :  { %864 = vmatpush1.bf16.msra.mxu0 %v1994_v9  ;;  %v2029_v55 = vld [vmem:[#allocation5 + $0x16c] ss:$12 sps:$4 sm:$0xff]   ;;  %v2032_v56 = vld [vmem:[#allocation5 + $0x168] ss:$12 sps:$4 sm:$0xff]   ;;  %v2077_v58 = vld [vmem:[#allocation5 + $0x290] ss:$12 sps:$4 sm:$0xff]  }
  0x5e   :  { %865 = vmatprep.subr.bf16.mxu0 %v1995_v10  ;;  %1870 = vmatpush3.bf16.msra.mxu1 %v2038_v27  ;;  %v2073_v57 = vld [vmem:[#allocation5 + $0x1b8] ss:$12 sps:$4 sm:$0xff]   ;;  %v2034_v60 = vld [vmem:[#allocation5 + $0x180] ss:$12 sps:$4 sm:$0xff]   ;;  %v2078_v61 = vld [vmem:[#allocation5 + $0x1d0] ss:$12 sps:$4 sm:$0xff]  }
  0x5f   :  { %1871 = vmatprep.subr.bf16.mxu1 %v2042_v29  ;;  %v2036_v59 = vld [vmem:[#allocation5 + $0x184] ss:$12 sps:$4 sm:$0xff]   ;;  %v2082_v62 = vld [vmem:[#allocation5 + $0x2a8] ss:$12 sps:$4 sm:$0xff]   ;;  %v2087_v2 = vld [vmem:[#allocation5 + $0x2c0] ss:$12 sps:$4 sm:$0xff]  }
  0x60   :  { %v2041_v63 = vld [vmem:[#allocation5 + $0x19c] ss:$12 sps:$4 sm:$0xff]   ;;  %v2039_v0 = vld [vmem:[#allocation5 + $0x198] ss:$12 sps:$4 sm:$0xff]   ;;  %v2046_v3 = vld [vmem:[#allocation5 + $0x1b4] ss:$12 sps:$4 sm:$0xff]  }
  0x61   :  { %866 = vmatpush1.bf16.msra.mxu0 %v1997_v11  ;;  %v2083_v1 = vld [vmem:[#allocation5 + $0x1e8] ss:$12 sps:$4 sm:$0xff]   ;;  %v2044_v4 = vld [vmem:[#allocation5 + $0x1b0] ss:$12 sps:$4 sm:$0xff]   ;;  %v2088_v5 = vld [vmem:[#allocation5 + $0x200] ss:$12 sps:$4 sm:$0xff]  }
  0x62   :  { %867 = vmatprep.subr.bf16.mxu0 %v1998_v12  ;;  %1872 = vmatpush3.bf16.msra.mxu1 %v2043_v30  ;;  %v2092_v6 = vld [vmem:[#allocation5 + $0x2d8] ss:$12 sps:$4 sm:$0xff]   ;;  %v84_v8 = vld [vmem:[#allocation2 + $0x18] sm:$0xff]  ;;  %v2054_v16 = vld [vmem:[#allocation5 + $0x1e0] ss:$12 sps:$4 sm:$0xff]   ;;  %vm842_vm1 = vcmask 1041408  }
  0x63   :  { %1873 = vmatprep.subr.bf16.mxu1 %v2047_v33  ;;  %v2051_v7 = vld [vmem:[#allocation5 + $0x1cc] ss:$12 sps:$4 sm:$0xff]   ;;  %v89_v9 = vpack.c.bf16 %v84_v8, %v84_v8  ;;  %v2049_v11 = vld [vmem:[#allocation5 + $0x1c8] ss:$12 sps:$4 sm:$0xff]   ;;  %v2097_v12 = vld [vmem:[#allocation5 + $0x2f0] ss:$12 sps:$4 sm:$0xff]  }
  0x64   :  { %v2093_v10 = vld [vmem:[#allocation5 + $0x218] ss:$12 sps:$4 sm:$0xff]   ;;  %v2098_v14 = vld [vmem:[#allocation5 + $0x230] ss:$12 sps:$4 sm:$0xff]   ;;  %v2102_v19 = vld [vmem:[#allocation5 + $0x308] ss:$12 sps:$4 sm:$0xff]  }
  0x65   :  { %868 = vmatpush1.bf16.msra.mxu0 %v2000_v15  ;;  %v2056_v13 = vld [vmem:[#allocation5 + $0x1e4] ss:$12 sps:$4 sm:$0xff]   ;;  %v83_v15 = vld [vmem:[#allocation2 + $0x10] sm:$0xff]  ;;  %v2066_v22 = vld [vmem:[#allocation5 + $0x214] ss:$12 sps:$4 sm:$0xff]   ;;  %vm843_vm2 = vcmask 1042432  }
  0x66   :  { %869 = vmatprep.subr.bf16.mxu0 %v2001_v18  ;;  %1874 = vmatpush3.bf16.msra.mxu1 %v2048_v35  ;;  %v2061_v17 = vld [vmem:[#allocation5 + $0x1fc] ss:$12 sps:$4 sm:$0xff]   ;;  %v2436_v18 = vpack.c.bf16 %v83_v15, %v83_v15  ;;  %v2071_v25 = vld [vmem:[#allocation5 + $0x22c] ss:$12 sps:$4 sm:$0xff]   ;;  %v2345_v29 = vmov 65535   ;;  %vm838_vm3 = vcmask 564224  }
  0x67   :  { %1875 = vmatprep.subr.bf16.mxu1 %v2052_v37  ;;  %v2064_v24 = vld [vmem:[#allocation5 + $0x210] ss:$12 sps:$4 sm:$0xff]   ;;  %v2069_v27 = vld [vmem:[#allocation5 + $0x228] ss:$12 sps:$4 sm:$0xff]   ;;  %v844_v30 = vsel %vm842_vm1, 4294967295, %v2345_v29  ;;  %v2346_v8 = vmov 0  }
  0x68   :  { %v2074_v33 = vld [vmem:[#allocation5 + $0x240] ss:$12 sps:$4 sm:$0xff]   ;;  %v2081_v35 = vld [vmem:[#allocation5 + $0x25c] ss:$12 sps:$4 sm:$0xff]  }
  0x69   :  { %870 = vmatpush1.bf16.msra.mxu0 %v2003_v20  ;;  %v2059_v20 = vld [vmem:[#allocation5 + $0x1f8] ss:$12 sps:$4 sm:$0xff]   ;;  %v2086_v37 = vld [vmem:[#allocation5 + $0x274] ss:$12 sps:$4 sm:$0xff]  }
  0x6a   :  { %871 = vmatprep.subr.bf16.mxu0 %v2004_v23  ;;  %1876 = vmatpush3.bf16.msra.mxu1 %v2053_v39  ;;  %v2106_v23 = vld [vmem:[#allocation5 + $0x320] ss:$12 sps:$4 sm:$0xff]   ;;  %v85_v39 = vld [vmem:[#allocation2 + $0x20] sm:$0xff] }
  0x6b   :  { %1877 = vmatprep.subr.bf16.mxu1 %v2057_v40  ;;  %v2129_v40 = vld [vmem:[#allocation7 + $0x4] ss:$8 sps:$4 sm:$0xff]   ;;  %v2130_v46 = vld [vmem:[#allocation7 + $0x10] ss:$8 sps:$4 sm:$0xff]  }
  0x6c   :  { %v2166_v29 = vld [vmem:[#allocation7 + $0xd0] ss:$8 sps:$4 sm:$0xff]  }
  0x6d   :  { %872 = vmatpush1.bf16.msra.mxu0 %v2006_v26  ;;  %v2110_v26 = vld [vmem:[#allocation5 + $0x338] ss:$12 sps:$4 sm:$0xff]  }
  0x6e   :  { %873 = vmatprep.subr.bf16.mxu0 %v2007_v28  ;;  %1878 = vmatpush3.bf16.msra.mxu1 %v2058_v44  ;;  %v2076_v28 = vld [vmem:[#allocation5 + $0x244] ss:$12 sps:$4 sm:$0xff]   ;;  %v2132_v44 = vld [vmem:[#allocation7 + $0x14] ss:$8 sps:$4 sm:$0xff]  }
  0x6f   :  { %1885 = vmatprep.subr.bf16.mxu1 %v2062_v45  ;;  %v2091_v45 = vld [vmem:[#allocation5 + $0x28c] ss:$12 sps:$4 sm:$0xff]  }
  0x71   :  { %874 = vmatpush1.bf16.msra.mxu0 %v2009_v31  ;;  %1011 = vmatmul.mubr.bf16.vlgmr.msra.gmra.mrb[0].mxu1 %v86_v49  ;;  %v2114_v31 = vld [vmem:[#allocation5 + $0x350] ss:$12 sps:$4 sm:$0xff]  }
  0x72   :  { %875 = vmatprep.subr.bf16.mxu0 %v2010_v32  ;;  %1886 = vmatpush3.bf16.msra.mxu1 %v2063_v48  ;;  %v2118_v32 = vld [vmem:[#allocation5 + $0x368] ss:$0 sps:$4 sm:$0x77]   ;;  %v2135_v48 = vld [vmem:[#allocation7 + $0x24] ss:$8 sps:$4 sm:$0xff]  }
  0x73   :  { %1887 = vmatprep.subr.bf16.mxu1 %v2067_v50  ;;  %1050 = vmatprep.mubr.bf16.mxu1 %v89_v9  ;;  %v2133_v50 = vld [vmem:[#allocation7 + $0x20] ss:$8 sps:$4 sm:$0xff]  }
  0x75   :  { %876 = vmatpush1.bf16.msra.mxu0 %v2012_v34  ;;  %v2439_v34 = vsel %vm843_vm2, %v844_v30, 0  ;;  %v2171_v30 = vld [vmem:[#allocation7 + $0xe4] ss:$8 sps:$4 sm:$0xff]  }
  0x76   :  { %877 = vmatprep.subr.bf16.mxu0 %v2013_v36  ;;  %1888 = vmatpush3.bf16.msra.mxu1 %v2068_v52  ;;  %v2079_v36 = vld [vmem:[#allocation5 + $0x258] ss:$12 sps:$4 sm:$0xff]   ;;  %v2138_v52 = vld [vmem:[#allocation7 + $0x34] ss:$8 sps:$4 sm:$0xff]  }
  0x77   :  { %1889 = vmatprep.subr.bf16.mxu1 %v2072_v54  ;;  %v2136_v54 = vld [vmem:[#allocation7 + $0x30] ss:$8 sps:$4 sm:$0xff]  }
  0x79   :  { %878 = vmatpush1.bf16.msra.mxu0 %v2015_v38  ;;  %v853_v38 = vand.u32 %v2118_v32, %v2439_v34  ;;  %v2174_v32 = vld [vmem:[#allocation7 + $0xf4] ss:$8 sps:$4 sm:$0xff]  }
  0x7a   :  { %879 = vmatprep.subr.bf16.mxu0 %v2016_v41  ;;  %1890 = vmatpush3.bf16.msra.mxu1 %v2073_v57  ;;  %v2127_v41 = vld [vmem:[#allocation7] ss:$8 sps:$4 sm:$0xff]  }
  0x7b   :  { %1891 = vmatprep.subr.bf16.mxu1 %v2077_v58  ;;  %v2105_v57 = vld [vmem:[#allocation5 + $0x2d4] ss:$12 sps:$4 sm:$0xff]  }
  0x7c   :  { %v2139_v58 = vld [vmem:[#allocation7 + $0x40] ss:$8 sps:$4 sm:$0xff]  }
  0x7d   :  { %880 = vmatpush1.bf16.msra.mxu0 %v2018_v42  ;;  %v2084_v42 = vld [vmem:[#allocation5 + $0x270] ss:$12 sps:$4 sm:$0xff]  }
  0x7e   :  { %881 = vmatprep.subr.bf16.mxu0 %v2019_v43  ;;  %1892 = vmatpush3.bf16.msra.mxu1 %v2078_v61  ;;  %v2442_v43 = vpack.c.bf16 %v85_v39, %v85_v39  ;;  %v2109_v61 = vld [vmem:[#allocation5 + $0x2ec] ss:$12 sps:$4 sm:$0xff]  }
  0x7f   :  { %1893 = vmatprep.subr.bf16.mxu1 %v2082_v62  ;;  %v2142_v62 = vld [vmem:[#allocation7 + $0x50] ss:$8 sps:$4 sm:$0xff]  }
  0x81   :  { %882 = vmatpush1.bf16.msra.mxu0 %v2022_v47  ;;  %v2089_v47 = vld [vmem:[#allocation5 + $0x288] ss:$12 sps:$4 sm:$0xff]  }
  0x82   :  { %883 = vmatprep.subr.bf16.mxu0 %v2024_v51  ;;  %1894 = vmatpush3.bf16.msra.mxu1 %v2083_v1  ;;  %v2094_v51 = vld [vmem:[#allocation5 + $0x2a0] ss:$12 sps:$4 sm:$0xff]   ;;  %v2113_v1 = vld [vmem:[#allocation5 + $0x304] ss:$12 sps:$4 sm:$0xff]  }
  0x83   :  { %1895 = vmatprep.subr.bf16.mxu1 %v2087_v2  ;;  %v2145_v2 = vld [vmem:[#allocation7 + $0x60] ss:$8 sps:$4 sm:$0xff]  }
  0x85   :  { %884 = vmatpush1.bf16.msra.mxu0 %v2027_v53  ;;  %v2101_v53 = vld [vmem:[#allocation5 + $0x2bc] ss:$12 sps:$4 sm:$0xff]  }
  0x86   :  { %885 = vmatprep.subr.bf16.mxu0 %v2029_v55  ;;  %1896 = vmatpush3.bf16.msra.mxu1 %v2088_v5  ;;  %v2099_v55 = vld [vmem:[#allocation5 + $0x2b8] ss:$12 sps:$4 sm:$0xff]   ;;  %v2150_v5 = vld [vmem:[#allocation7 + $0x74] ss:$8 sps:$4 sm:$0xff]  }
  0x87   :  { %1897 = vmatprep.subr.bf16.mxu1 %v2092_v6  ;;  %v2148_v6 = vld [vmem:[#allocation7 + $0x70] ss:$8 sps:$4 sm:$0xff]  }
  0x89   :  { %886 = vmatpush1.bf16.msra.mxu0 %v2032_v56  ;;  %v2141_v56 = vld [vmem:[#allocation7 + $0x44] ss:$8 sps:$4 sm:$0xff]  }
  0x8a   :  { %896 = vmatprep.subr.bf16.mxu0 %v2036_v59  ;;  %1898 = vmatpush3.bf16.msra.mxu1 %v2093_v10  ;;  %v2103_v59 = vld [vmem:[#allocation5 + $0x2d0] ss:$12 sps:$4 sm:$0xff]   ;;  %v2121_v10 = vld [vmem:[#allocation5 + $0x334] ss:$12 sps:$4 sm:$0xff]  }
  0x8b   :  { %1899 = vmatprep.subr.bf16.mxu1 %v2097_v12  ;;  %v2151_v12 = vld [vmem:[#allocation7 + $0x80] ss:$8 sps:$4 sm:$0xff]  }
  0x8c   :  { %888 = vmatmul.mubr.bf16.vlgmr.msra.gmra.mrb[0].mxu0 %v86_v49  ;;  %v2096_v49 = vld [vmem:[#allocation5 + $0x2a4] ss:$12 sps:$4 sm:$0xff]  }
  0x8d   :  { %897 = vmatpush1.bf16.msra.mxu0 %v2034_v60  ;;  %928 = vmatprep.mubr.bf16.mxu0 %v89_v9  ;;  %v2144_v60 = vld [vmem:[#allocation7 + $0x54] ss:$8 sps:$4 sm:$0xff]   ;;  %v2153_v9 = vld [vmem:[#allocation7 + $0x84] ss:$8 sps:$4 sm:$0xff]  }
  0x8e   :  { %898 = vmatprep.subr.bf16.mxu0 %v2041_v63  ;;  %1900 = vmatpush3.bf16.msra.mxu1 %v2098_v14  ;;  %v2107_v63 = vld [vmem:[#allocation5 + $0x2e8] ss:$12 sps:$4 sm:$0xff]   ;;  %v2124_v14 = vld [vmem:[#allocation5 + $0x34c] ss:$12 sps:$4 sm:$0xff]  }
  0x8f   :  { %1935 = vmatprep.subr.bf16.mxu1 %v2343_v21 }
  0x91   :  { %899 = vmatpush1.bf16.msra.mxu0 %v2039_v0  ;;  %1051 = vmatmul.mubr.bf16.vlgmr.msra.gmra.mrb[4].mxu1 %v2436_v18  ;;  %v2147_v0 = vld [vmem:[#allocation7 + $0x64] ss:$8 sps:$4 sm:$0xff]  }
  0x92   :  { %900 = vmatprep.subr.bf16.mxu0 %v2046_v3  ;;  %1936 = vmatpush3.bf16.msra.mxu1 %v2102_v19  ;;  %v2111_v3 = vld [vmem:[#allocation5 + $0x300] ss:$12 sps:$4 sm:$0xff]   ;;  %v2154_v19 = vld [vmem:[#allocation7 + $0x90] ss:$8 sps:$4 sm:$0xff]  }
  0x93   :  { %1945 = vmatprep.mubr.msk.bf16.mxu1 %vm2344_vm0, %v2343_v21  ;;  %1937 = vmatprep.subr.bf16.mxu1 %v2343_v21 }
  0x95   :  { %901 = vmatpush1.bf16.msra.mxu0 %v2044_v4  ;;  %v2117_v4 = vld [vmem:[#allocation5 + $0x31c] ss:$12 sps:$4 sm:$0xff]  }
  0x96   :  { %902 = vmatprep.subr.bf16.mxu0 %v2051_v7  ;;  %1938 = vmatpush3.bf16.msra.mxu1 %v2106_v23  ;;  %v2115_v7 = vld [vmem:[#allocation5 + $0x318] ss:$12 sps:$4 sm:$0xff]  }
  0x97   :  { %1939 = vmatprep.subr.bf16.mxu1 %v2343_v21  ;;  %v2159_v23 = vld [vmem:[#allocation7 + $0xa4] ss:$8 sps:$4 sm:$0xff]  }
  0x99   :  { %903 = vmatpush1.bf16.msra.mxu0 %v2049_v11  ;;  %v235_v11 = vld [vmem:[#allocation5 + $0x360] sm:$0x77] }
  0x9a   :  { %904 = vmatprep.subr.bf16.mxu0 %v2056_v13  ;;  %1940 = vmatpush3.bf16.msra.mxu1 %v2110_v26  ;;  %v2119_v13 = vld [vmem:[#allocation5 + $0x330] ss:$12 sps:$4 sm:$0xff]   ;;  %v1794_v15 = vcombine.high %v235_v11, %v235_v11 }
  0x9b   :  { %1941 = vmatprep.subr.bf16.mxu1 %v2343_v21  ;;  %v2165_v26 = vld [vmem:[#allocation7 + $0xc4] ss:$8 sps:$4 sm:$0xff]  }
  0x9d   :  { %905 = vmatpush1.bf16.msra.mxu0 %v2054_v16  ;;  %v2122_v16 = vld [vmem:[#allocation5 + $0x348] ss:$12 sps:$4 sm:$0xff]  }
  0x9e   :  { %906 = vmatprep.subr.bf16.mxu0 %v2061_v17  ;;  %1942 = vmatpush3.bf16.msra.mxu1 %v2114_v31  ;;  %v1793_v17 = vcombine.low %v235_v11, %v235_v11  ;;  %v2169_v31 = vld [vmem:[#allocation7 + $0xe0] ss:$8 sps:$4 sm:$0xff]  }
  0x9f   :  { %1943 = vmatprep.subr.bf16.mxu1 %v2343_v21 }
  0xa0   :  { %v847_v21 = vand.u32 %v1793_v17, %v2439_v34 }
  0xa1   :  { %907 = vmatpush1.bf16.msra.mxu0 %v2059_v20  ;;  %v2156_v20 = vld [vmem:[#allocation7 + $0x94] ss:$8 sps:$4 sm:$0xff]  }
  0xa2   :  { %908 = vmatprep.subr.bf16.mxu0 %v2066_v22  ;;  %1944 = vmatpush3.bf16.msra.mxu1 %v853_v38  ;;  %v2157_v22 = vld [vmem:[#allocation7 + $0xa0] ss:$8 sps:$4 sm:$0xff]  }
  0xa3   :  { %1404 = vmatprep.subr.bf16.mxu1 %v2129_v40  ;;  %v2199_v40 = vld [vmem:[#allocation8 + $0x40] sm:$0xff]  }
  0xa5   :  { %909 = vmatpush1.bf16.msra.mxu0 %v2064_v24  ;;  %1946 = vmatmul.mubr.msk.bf16.vlgmr.msra.gmra.mrb[8].mxu1 %vm838_vm3, %v2442_v43  ;;  %v2160_v24 = vld [vmem:[#allocation7 + $0xb0] ss:$8 sps:$4 sm:$0xff]  }
  0xa6   :  { %910 = vmatprep.subr.bf16.mxu0 %v2071_v25  ;;  %1405 = vmatpush1.bf16.msra.mxu1 %v2127_v41  ;;  %v2162_v25 = vld [vmem:[#allocation7 + $0xb4] ss:$8 sps:$4 sm:$0xff]   ;;  %v2200_v41 = vld [vmem:[#allocation8] sm:$0xff]  }
  0xa7   :  { %1406 = vmatprep.subr.bf16.mxu1 %v2132_v44  ;;  %v2203_v44 = vld [vmem:[#allocation8 + $0x50] sm:$0xff]  }
  0xa9   :  { %911 = vmatpush1.bf16.msra.mxu0 %v2069_v27  ;;  %v2163_v27 = vld [vmem:[#allocation7 + $0xc0] ss:$8 sps:$4 sm:$0xff]  }
  0xaa   :  { %912 = vmatprep.subr.bf16.mxu0 %v2076_v28  ;;  %1407 = vmatpush1.bf16.msra.mxu1 %v2130_v46  ;;  %v2168_v28 = vld [vmem:[#allocation7 + $0xd4] ss:$8 sps:$4 sm:$0xff]  }
  0xab   :  { %1408 = vmatprep.subr.bf16.mxu1 %v2135_v48  ;;  %v2204_v46 = vld [vmem:[#allocation8 + $0x10] sm:$0xff]  }
  0xad   :  { %913 = vmatpush1.bf16.msra.mxu0 %v2074_v33  ;;  %v2172_v33 = vld [vmem:[#allocation7 + $0xf0] ss:$8 sps:$4 sm:$0xff]  }
  0xae   :  { %914 = vmatprep.subr.bf16.mxu0 %v2081_v35  ;;  %1409 = vmatpush1.bf16.msra.mxu1 %v2133_v50  ;;  %v2207_v50 = vld [vmem:[#allocation8 + $0x60] sm:$0xff]  }
  0xaf   :  { %1410 = vmatprep.subr.bf16.mxu1 %v2138_v52  ;;  %v237_v52 = vld [vmem:[%s2481_s2] sm:$0x7] }
  0xb1   :  { %915 = vmatpush1.bf16.msra.mxu0 %v2079_v36 }
  0xb2   :  { %916 = vmatprep.subr.bf16.mxu0 %v2086_v37  ;;  %1411 = vmatpush1.bf16.msra.mxu1 %v2136_v54  ;;  %v2209_v54 = vld [vmem:[#allocation8 + $0x68] sm:$0xff]  }
  0xb3   :  { %1412 = vmatprep.subr.bf16.mxu1 %v2141_v56  ;;  %v2210_v56 = vld [vmem:[#allocation8 + $0x28] sm:$0xff]  }
  0xb5   :  { %917 = vmatpush1.bf16.msra.mxu0 %v2084_v42  ;;  %v2201_v42 = vld [vmem:[#allocation8 + $0x48] sm:$0xff]  }
  0xb6   :  { %918 = vmatprep.subr.bf16.mxu0 %v2091_v45  ;;  %1413 = vmatpush1.bf16.msra.mxu1 %v2139_v58  ;;  %v239_v45 = vlaneseq }
  0xb7   :  { %1414 = vmatprep.subr.bf16.mxu1 %v2144_v60 }
  0xb8   :  { %v2452_v48 = vshrl.u32 %v239_v45, 7 }
  0xb9   :  { %919 = vmatpush1.bf16.msra.mxu0 %v2089_v47  ;;  %v2205_v47 = vld [vmem:[#allocation8 + $0x58] sm:$0xff]  }
  0xba   :  { %920 = vmatprep.subr.bf16.mxu0 %v2096_v49  ;;  %1415 = vmatpush1.bf16.msra.mxu1 %v2142_v62  ;;  %v2206_v49 = vld [vmem:[#allocation8 + $0x18] sm:$0xff]  }
  0xbb   :  { %1416 = vmatprep.subr.bf16.mxu1 %v2147_v0 }
  0xbd   :  { %921 = vmatpush1.bf16.msra.mxu0 %v2094_v51  ;;  %v249_v51 = vsub.s32 2, %v2452_v48 }
  0xbe   :  { %922 = vmatprep.subr.bf16.mxu0 %v2101_v53  ;;  %1417 = vmatpush1.bf16.msra.mxu1 %v2145_v2  ;;  %v2208_v53 = vld [vmem:[#allocation8 + $0x20] sm:$0xff]  }
  0xbf   :  { %1418 = vmatprep.subr.bf16.mxu1 %v2150_v5  ;;  %v241_v5 = vsub.s32 0, %v2452_v48 }
  0xc1   :  { %923 = vmatpush1.bf16.msra.mxu0 %v2099_v55  ;;  %v250_v55 = vrot.slane %v237_v52, %v249_v51 }
  0xc2   :  { %924 = vmatprep.subr.bf16.mxu0 %v2105_v57  ;;  %1419 = vmatpush1.bf16.msra.mxu1 %v2148_v6  ;;  %v245_v6 = vsub.s32 1, %v2452_v48 }
  0xc3   :  { %1420 = vmatprep.subr.bf16.mxu1 %v2153_v9 }
  0xc4   :  { %v246_v9 = vrot.slane %v237_v52, %v245_v6 }
  0xc5   :  { %925 = vmatpush1.bf16.msra.mxu0 %v2103_v59 }
  0xc6   :  { %926 = vmatprep.subr.bf16.mxu0 %v2109_v61  ;;  %1421 = vmatpush1.bf16.msra.mxu1 %v2151_v12 }
  0xc7   :  { %1422 = vmatprep.subr.bf16.mxu1 %v2156_v20 }
  0xc9   :  { %927 = vmatpush1.bf16.msra.mxu0 %v2107_v63 }
  0xca   :  { %937 = vmatprep.subr.bf16.mxu0 %v2113_v1  ;;  %1423 = vmatpush1.bf16.msra.mxu1 %v2154_v19  ;;  %v2175_v19 = vld [vmem:[#allocation7 + $0x100] ss:$8 sps:$4 sm:$0xff]  }
  0xcb   :  { %1424 = vmatprep.subr.bf16.mxu1 %v2159_v23  ;;  %v2183_v23 = vld [vmem:[#allocation7 + $0x124] ss:$8 sps:$4 sm:$0xff]  }
  0xcc   :  { %929 = vmatmul.mubr.bf16.vlgmr.msra.gmra.mrb[0].mxu0 %v2436_v18  ;;  %v850_v18 = vand.u32 %v1794_v15, %v2439_v34  ;;  %v2177_v34 = vld [vmem:[#allocation7 + $0x104] ss:$8 sps:$4 sm:$0xff]  }
  0xcd   :  { %938 = vmatpush1.bf16.msra.mxu0 %v2111_v3  ;;  %969 = vmatprep.mubr.bf16.mxu0 %v2346_v8 }
  0xce   :  { %939 = vmatprep.subr.bf16.mxu0 %v2117_v4  ;;  %1425 = vmatpush1.bf16.msra.mxu1 %v2157_v22  ;;  %v2178_v22 = vld [vmem:[#allocation7 + $0x110] ss:$8 sps:$4 sm:$0xff]  }
  0xcf   :  { %1426 = vmatprep.subr.bf16.mxu1 %v2162_v25  ;;  %v2186_v25 = vld [vmem:[#allocation7 + $0x134] ss:$8 sps:$4 sm:$0xff]  }
  0xd1   :  { %940 = vmatpush1.bf16.msra.mxu0 %v2115_v7  ;;  %v242_v7 = vrot.slane %v237_v52, %v241_v5 }
  0xd2   :  { %941 = vmatprep.subr.bf16.mxu0 %v2121_v10  ;;  %1427 = vmatpush1.bf16.msra.mxu1 %v2160_v24  ;;  %v2181_v24 = vld [vmem:[#allocation7 + $0x120] ss:$8 sps:$4 sm:$0xff]  }
  0xd3   :  { %1428 = vmatprep.subr.bf16.mxu1 %v2165_v26  ;;  %v2184_v26 = vld [vmem:[#allocation7 + $0x130] ss:$8 sps:$4 sm:$0xff]  }
  0xd5   :  { %942 = vmatpush1.bf16.msra.mxu0 %v2119_v13 }
  0xd6   :  { %943 = vmatprep.subr.bf16.mxu0 %v2124_v14  ;;  %1429 = vmatpush1.bf16.msra.mxu1 %v2163_v27  ;;  %v2189_v27 = vld [vmem:[#allocation7 + $0x144] ss:$8 sps:$4 sm:$0xff]  }
  0xd7   :  { %1430 = vmatprep.subr.bf16.mxu1 %v2168_v28  ;;  %v2187_v28 = vld [vmem:[#allocation7 + $0x140] ss:$8 sps:$4 sm:$0xff]  }
  0xd9   :  { %944 = vmatpush1.bf16.msra.mxu0 %v2122_v16 }
  0xda   :  { %945 = vmatprep.subr.bf16.mxu0 %v850_v18  ;;  %1431 = vmatpush1.bf16.msra.mxu1 %v2166_v29  ;;  %v2192_v29 = vld [vmem:[#allocation7 + $0x154] ss:$8 sps:$4 sm:$0xff]  }
  0xdb   :  { %1432 = vmatprep.subr.bf16.mxu1 %v2171_v30  ;;  %v2190_v30 = vld [vmem:[#allocation7 + $0x150] ss:$8 sps:$4 sm:$0xff]  }
  0xdd   :  { %946 = vmatpush1.bf16.msra.mxu0 %v847_v21  ;;  %v2180_v21 = vld [vmem:[#allocation7 + $0x114] ss:$8 sps:$4 sm:$0xff]  }
  0xde   :  { %1433 = vmatpush1.bf16.msra.mxu1 %v2169_v31  ;;  %1913 = vmatprep.subr.bf16.mxu0 %v2199_v40  ;;  %v2195_v31 = vld [vmem:[#allocation7 + $0x164] ss:$8 sps:$4 sm:$0xff]  }
  0xdf   :  { %1434 = vmatprep.subr.bf16.mxu1 %v2174_v32  ;;  %v2198_v32 = vld [vmem:[#allocation7 + $0x174] ss:$8 sps:$4 sm:$0xff]   ;;  %v1152_v40 = vld [vmem:[%s2483_s4] sm:$0x3]  ;;  %s2347_s4 = smov [#allocation10]  }
  0xe0   :  { %1796 = vmatmul.mubr.msk.bf16.vlgmr.msra.gmra.mrb[0].mxu0 %vm838_vm3, %v2442_v43  ;;  %v2202_v43 = vld [vmem:[#allocation8 + $0x8] sm:$0xff]   ;;  %s1674_s9 = sshll.u32 %s2347_s4, 4  ;;  %s1675_s9 = int_to_ptr.vmem [resolvable:$true] %s1674_s9 }
  0xe1   :  { %1914 = vmatpush3.bf16.msra.mxu0 %v2200_v41  ;;  %v1157_v41 = vrot.slane %v1152_v40, %v241_v5  ;;  %s2303_s10 = scalar_lea.vmem %s1675_s9, 64  ;;  %p2308_p5 = scmp.lt.s32.totalorder %s1675_s9, %s1675_s9 }
  0xe2   :  { %1435 = vmatpush1.bf16.msra.mxu1 %v2172_v33  ;;  %1915 = vmatprep.subr.bf16.mxu0 %v2201_v42  ;;  %v2196_v33 = vld [vmem:[#allocation7 + $0x170] ss:$8 sps:$4 sm:$0xff]   ;;  %v1161_v42 = vrot.slane %v1152_v40, %v245_v6  ;;  %p2304_p4 = scmp.ne.s32.totalorder %s1675_s9, %s2303_s10  ;;  %p2309_p6 = scmp.lt.s32.totalorder %s2303_s10, %s2303_s10 }
  0xe3   :  { %1445 = vmatprep.subr.bf16.mxu1 %v2177_v34 }
  0xe4   :  { %p2310_p7 = por %p2309_p6, %p2308_p5 }
  0xe5   :  { %1916 = vmatpush3.bf16.msra.mxu0 %v2202_v43 }
  0xe6   :  { %1917 = vmatprep.subr.bf16.mxu0 %v2203_v44  ;;  %p2311_p8 = pnand %p2310_p7, %p2304_p4 }
  0xe9   :  { %1918 = vmatpush3.bf16.msra.mxu0 %v2204_v46 }
  0xea   :  { %1919 = vmatprep.subr.bf16.mxu0 %v2205_v47 }
  0xed   :  { %1920 = vmatpush3.bf16.msra.mxu0 %v2206_v49 }
  0xee   :  { %1921 = vmatprep.subr.bf16.mxu0 %v2207_v50 }
  0xf1   :  { %1922 = vmatpush3.bf16.msra.mxu0 %v2208_v53 }
  0xf2   :  { %1923 = vmatprep.subr.bf16.mxu0 %v2209_v54  ;;  %v1846_v54 = vld [vmem:[%s2485_s6] ss:$0 sm:$0xff] }
  0xf5   :  { %1924 = vmatpush3.bf16.msra.mxu0 %v2210_v56 }
 0x144   :  { %v1879_v35 = vpop.f32.mrb[0].mxu1 }
 0x145   :  { %v1880_v36 = vpop.f32.mrb[1].mxu1 }
 0x146   :  { %v1881_v37 = vadd.f32 %v1880_v36, %v1879_v35  ;;  %v1882_v38 = vpop.f32.mrb[2].mxu1  ;;  %v2211_v36 = vld [vmem:[#allocation8 + $0x70] sm:$0xff]  }
 0x147   :  { %v1883_v39 = vpop.f32.mrb[3].mxu1  ;;  %1925 = vmatprep.subr.bf16.mxu0 %v2211_v36  ;;  %v2213_v38 = vld [vmem:[#allocation8 + $0x78] sm:$0xff]  }
 0x148   :  { %v1013_v57 = vadd.f32 %v1881_v37, %v250_v55  ;;  %v2212_v37 = vld [vmem:[#allocation8 + $0x30] sm:$0xff]   ;;  %v2214_v39 = vld [vmem:[#allocation8 + $0x38] sm:$0xff]  }
 0x149   :  { %1926 = vmatpush3.bf16.msra.mxu0 %v2212_v37 }
 0x14a   :  { %1927 = vmatprep.subr.bf16.mxu0 %v2213_v38 }
 0x14d   :  { %1928 = vmatpush3.bf16.msra.mxu0 %v2214_v39 }
 0x164   :  { %v1901_v58 = vpop.f32.mrb[4].mxu1 }
 0x165   :  { %v1902_v59 = vpop.f32.mrb[5].mxu1 }
 0x166   :  { %v1903_v60 = vadd.f32 %v1902_v59, %v1901_v58  ;;  %v1904_v61 = vpop.f32.mrb[6].mxu1 }
 0x167   :  { %v1905_v62 = vpop.f32.mrb[7].mxu1 }
 0x168   :  { %v1053_v63 = vadd.f32 %v1903_v60, %v1013_v57 }
 0x178   :  { %v1092_v0 = vpop.f32.mrb[8].mxu1 }
 0x179   :  { %v1093_v1 = vadd.f32 %v1092_v0, %v1053_v63  ;;  %v1947_v2 = vpop.f32.mrb[9].mxu1 }
 0x17a   :  { %v1095_v3 = vpop.f32.mrb[10].mxu1 }
 0x17b   :  { %v1948_v4 = vpop.f32.mrb[11].mxu1  ;;  %v1100_v34 = vmax.f32 %v1093_v1, 0.0 }
 0x17d   :  { %v1103_v35 = vpack.c.bf16 %v1100_v34, %v1100_v34 }
 0x1b3   :  { %v971_v10 = vpop.f32.mrb[0].mxu0 }
 0x1b4   :  { %v1949_v11 = vadd.f32 %v971_v10, %v242_v7  ;;  %v973_v12 = vpop.f32.mrb[1].mxu0 }
 0x1b5   :  { %v1950_v13 = vadd.f32 %v973_v12, %v246_v9  ;;  %v975_v14 = vpop.f32.mrb[2].mxu0 }
 0x1b6   :  { %v1098_v15 = vmax.f32 %v1949_v11, 0.0  ;;  %v976_v16 = vpop.f32.mrb[3].mxu0 }
 0x1b7   :  { %v1099_v17 = vmax.f32 %v1950_v13, 0.0 }
 0x1b8   :  { %v1101_v20 = vpack.c.bf16 %v1098_v15, %v1098_v15 }
 0x1b9   :  { %v1102_v18 = vpack.c.bf16 %v1099_v17, %v1099_v17 }
 0x1bb   :  { %1436 = vmatprep.mubr.bf16.mxu1 %v1102_v18 }
 0x1bc   :  { %1437 = vmatmul.mubr.bf16.vlgmr.msra.gmra.mrb[12].mxu1 %v1101_v20 }
 0x1bd   :  { %1446 = vmatpush1.bf16.msra.mxu1 %v2175_v19  ;;  %1477 = vmatprep.mubr.bf16.mxu1 %v2346_v8  ;;  %v2193_v8 = vld [vmem:[#allocation7 + $0x160] ss:$8 sps:$4 sm:$0xff]  }
 0x1be   :  { %1447 = vmatprep.subr.bf16.mxu1 %v2180_v21 }
 0x1c1   :  { %1448 = vmatpush1.bf16.msra.mxu1 %v2178_v22 }
 0x1c2   :  { %1449 = vmatprep.subr.bf16.mxu1 %v2183_v23 }
 0x1c5   :  { %1450 = vmatpush1.bf16.msra.mxu1 %v2181_v24 }
 0x1c6   :  { %1451 = vmatprep.subr.bf16.mxu1 %v2186_v25 }
 0x1c9   :  { %1452 = vmatpush1.bf16.msra.mxu1 %v2184_v26 }
 0x1ca   :  { %1453 = vmatprep.subr.bf16.mxu1 %v2189_v27 }
 0x1cd   :  { %1454 = vmatpush1.bf16.msra.mxu1 %v2187_v28 }
 0x1ce   :  { %1455 = vmatprep.subr.bf16.mxu1 %v2192_v29 }
 0x1d1   :  { %1456 = vmatpush1.bf16.msra.mxu1 %v2190_v30 }
 0x1d2   :  { %1457 = vmatprep.subr.bf16.mxu1 %v2195_v31 }
 0x1d5   :  { %1458 = vmatpush1.bf16.msra.mxu1 %v2193_v8 }
 0x1d6   :  { %1459 = vmatprep.subr.bf16.mxu1 %v2198_v32 }
 0x1d9   :  { %1460 = vmatpush1.bf16.msra.mxu1 %v2196_v33 }
 0x1dc   :  { %1478 = vmatmul.mubr.bf16.vlgmr.msra.gmra.mrb[12].mxu1 %v1103_v35 }
 0x2af   :  { %v1479_v43 = vpop.f32.mrb[12].mxu1 }
 0x2b0   :  { %v1951_v44 = vadd.f32 %v1479_v43, %v1157_v41  ;;  %v1481_v45 = vpop.f32.mrb[13].mxu1 }
 0x2b1   :  { %v1952_v46 = vadd.f32 %v1481_v45, %v1161_v42  ;;  %v1483_v47 = vpop.f32.mrb[14].mxu1 }
 0x2b2   :  { %v1486_v48 = vmax.f32 %v1951_v44, 0.0  ;;  %v1484_v49 = vpop.f32.mrb[15].mxu1 }
 0x2b3   :  { %v1487_v50 = vmax.f32 %v1952_v46, 0.0 }
 0x2b4   :  { %v1488_v52 = vpack.c.bf16 %v1486_v48, %v1486_v48 }
 0x2b5   :  { %v1489_v51 = vpack.c.bf16 %v1487_v50, %v1487_v50 }
 0x2b7   :  { %1657 = vmatprep.mubr.bf16.mxu0 %v1489_v51 }
 0x2b8   :  { %1658 = vmatmul.mubr.bf16.vlgmr.msra.gmra.mrb[4].mxu0 %v1488_v52 }
 0x38b   :  { %v1929_v53 = vpop.f32.mrb[4].mxu0 }
 0x38c   :  { %v1930_v55 = vpop.f32.mrb[5].mxu0 }
 0x38d   :  { %v1931_v56 = vadd.f32 %v1930_v55, %v1929_v53  ;;  %v1932_v57 = vpop.f32.mrb[6].mxu0 }
 0x38e   :  { %v1933_v58 = vpop.f32.mrb[7].mxu0 }
 0x38f   :  { %v1660_v59 = vadd.f32 %v1931_v56, %v1846_v54 }
 0x391   :  { %v1665_v60 = vmax.f32 %v1660_v59, 0.0 }
 0x393   :  { %v1666_v61 = vpack.c.bf16 %v1665_v60, %v1665_v60 }
 0x395   :  { %1667 = vst [vmem:[#allocation10] sm:$0xf] %v1666_v61 }
 0x396   :  { %2314 = shalt.err (!%p2311_p8)
}
 0x397   :  { %s2315_s12 = scalar_lea.hbm %s2486_s7, 64 }
 0x398   :  { %p2316_p9 = scmp.ne.s32.totalorder %s2486_s7, %s2315_s12  ;;  %p2319_p10 = scmp.lt.u32.totalorder %s2315_s12, %s2486_s7 }
 0x39a   :  { %p2321_p11 = pnand %p2319_p10, %p2316_p9 }
 0x39c   :  { %2324 = shalt.err (!%p2321_p11)
}
 0x39d   :  { %1677 = dma.vmem_to_hbm [thread:$0]  %s1675_s9, 64, %s2486_s7, [#allocation4]  }
 0x39e   :  { %2331 = dma.done.wait [#allocation4], 64  }
 0x39f   :  { %2332 = vsyncadd [#allocation4], 4294967232 }
 0x3a0   :  { %1681 = vsyncpa [#allocation3], 1 }
 0x3a1   :  { %1682 = vsyncpa [#allocation6], 1 }
 0x3a2   :  { %1683 = vsyncpa [#allocation9], 1 }
 0x3a3   :  { %1684 = vsyncpa [#allocation4], 1 }

</bundles_post_ra>
